<compile_context>
chip_gen: v7x
topology: tpu7x:2x2x1
jax: 0.10.0
libtpu: 0.0.40
codegen_flags: <defaults>
</compile_context>

<pallas_src>
import functools

import jax
import jax.numpy as jnp
from jax.experimental import pallas as pl
from jax.experimental.pallas import tpu as pltpu


def _view_avg_kernel(x_ref, w_ref, b_ref, aux_ref, pooled_ref, acc_ref,
                     *, rb, V, C, S, Fp):
    """One (batch-tile, S-chunk) grid step.

    x_ref:      (rb*V*C, ts)  native dtype  -- flattened (batch*view*channel, spatial) chunk
    w_ref:      (C, Fp)       float32       -- projection weight (F padded to Fp)
    b_ref:      (1, Fp)       float32
    aux_ref:    (rb*V, Fp)    float32 out   -- per-view features for this batch tile
    pooled_ref: (rb, Fp)      float32 out   -- view-averaged features
    acc_ref:    (rb*V*C, 1)   float32 VMEM  -- per-row spatial-sum accumulator
    """
    k = pl.program_id(1)
    nk = pl.num_programs(1)

    @pl.when(k == 0)
    def _init():
        acc_ref[...] = jnp.zeros_like(acc_ref)

    # Partial spatial sum for this S-chunk (upcast per-tile; lane reduce -> XLU).
    x = x_ref[...].astype(jnp.float32)                     # (rb*V*C, ts)
    acc_ref[...] += jnp.sum(x, axis=-1, keepdims=True)     # (rb*V*C, 1)

    @pl.when(k == nk - 1)
    def _finalize():
        nv = rb * V
        inv_s = 1.0 / float(S)

        # Linear projection C -> F without reshaping the accumulator:
        # channel c of every view is a sublane-strided slice of acc; combine
        # with weight row c as a rank-1 update (C is tiny, pure VPU work).
        feat = jnp.zeros((nv, Fp), jnp.float32) + b_ref[...]
        for c in range(C):
            ch_mean = acc_ref[pl.ds(c, nv, stride=C), :] * inv_s   # (nv, 1)
            feat = feat + ch_mean * w_ref[pl.ds(c, 1), :]          # (1, Fp) bcast

        aux_ref[...] = feat.astype(aux_ref.dtype)

        # View average: gather the V views of each batch item with strided
        # reads of the just-written per-view features and scale by 1/V.
        pooled = jnp.zeros((rb, Fp), jnp.float32)
        for v in range(V):
            pooled = pooled + aux_ref[pl.ds(v, rb, stride=V), :]
        pooled_ref[...] = (pooled * (1.0 / float(V))).astype(pooled_ref.dtype)


def view_avg_aggregate(mvimages, weight, bias, *,
                       target_tile_bytes=4 << 20, max_spatial_tile=None):
    """Forward pass of ViewAvgAggregate with the synthetic backbone.

    Returns (pooled_view.squeeze(), aux) like the PyTorch module:
      aux:         (B, V, F) per-view features
      pooled_view: squeeze(mean over view dim)
    """
    B, V, C, D, H, W = mvimages.shape
    Cw, F = weight.shape
    assert Cw == C
    S = D * H * W
    rows = B * V * C

    # Lane-dense outputs: pad feature dim to a multiple of 128, slice later.
    Fp = ((F + 127) // 128) * 128

    # Keep the native dtype in HBM (no wrapper upcast -> no extra HBM pass).
    x2 = mvimages.reshape(rows, S)
    itemsize = int(x2.dtype.itemsize)
    w_p = jnp.pad(weight.astype(jnp.float32), ((0, 0), (0, Fp - F)))
    b_p = jnp.pad(bias.astype(jnp.float32).reshape(-1), ((0, Fp - F),)).reshape(1, Fp)

    # ---- tile selection ----------------------------------------------------
    # Batch tile rb: output blocks need rb % 8 == 0 or rb == B (full extent).
    rb = 8 if (B % 8 == 0) else B
    tr = rb * V * C

    # Spatial tile ts: largest multiple of 128 dividing S within the byte
    # budget; fall back to the full extent if S is not a multiple of 128.
    ts = S
    cap = max(128, target_tile_bytes // max(1, tr * itemsize))
    if max_spatial_tile is not None:
        cap = min(cap, max_spatial_tile)
    if S % 128 == 0:
        t, best, limit = 128, None, min(S, cap)
        while t <= limit:
            if S % t == 0:
                best = t
            t += 128
        if best is not None:
            ts = best
    # TODO(synk): for S not a multiple of 128 we use one full-S block per row
    # tile; zero-padding S (sum-neutral) would restore lane-aligned chunking.

    # Grow the batch tile while it divides B and the input tile stays small.
    while B % (rb * 2) == 0 and (rb * 2) * V * C * ts * itemsize <= target_tile_bytes:
        rb *= 2
    tr = rb * V * C
    grid = (B // rb, S // ts)
    # -------------------------------------------------------------------------

    kernel = functools.partial(_view_avg_kernel, rb=rb, V=V, C=C, S=S, Fp=Fp)

    cost = pl.CostEstimate(
        flops=rows * S + 2 * B * V * C * Fp + B * V * Fp,
        transcendentals=0,
        bytes_accessed=rows * S * itemsize + (C + 1) * Fp * 4
                       + (B * V + B) * Fp * 4,
    )

    aux_flat, pooled = pl.pallas_call(
        kernel,
        grid=grid,
        in_specs=[
            pl.BlockSpec((tr, ts), lambda i, k: (i, k)),
            pl.BlockSpec((C, Fp), lambda i, k: (0, 0)),
            pl.BlockSpec((1, Fp), lambda i, k: (0, 0)),
        ],
        out_specs=[
            pl.BlockSpec((rb * V, Fp), lambda i, k: (i, 0)),
            pl.BlockSpec((rb, Fp), lambda i, k: (i, 0)),
        ],
        out_shape=[
            jax.ShapeDtypeStruct((B * V, Fp), jnp.float32),
            jax.ShapeDtypeStruct((B, Fp), jnp.float32),
        ],
        scratch_shapes=[pltpu.VMEM((tr, 1), jnp.float32)],
        compiler_params=pltpu.CompilerParams(
            dimension_semantics=("parallel", "arbitrary"),
            vmem_limit_bytes=48 * 1024 * 1024,
        ),
        cost_estimate=cost,
    )(x2, w_p, b_p)

    aux = aux_flat[:, :F].reshape(B, V, F)
    pooled_view = jnp.squeeze(pooled[:, :F])   # torch .squeeze(): drops all size-1 dims
    return pooled_view, aux


def _reference(mvimages, weight, bias):
    """Pure-JAX reference with identical semantics."""
    B, V, C, D, H, W = mvimages.shape
    x = mvimages.reshape(B * V, C, D * H * W).astype(jnp.float32)
    feat = jnp.mean(x, axis=-1) @ weight + bias            # (B*V, F)
    aux = feat.reshape(B, V, -1)
    pooled = jnp.squeeze(jnp.mean(aux, axis=1))
    return pooled, aux


if __name__ == "__main__":
    # TODO(synk): torch.utils.checkpoint is a training-time remat trick with no
    # forward-semantics effect; intentionally omitted.  Empty lifting_net = id.
    B, V, C, D, H, W = 2, 4, 4, 4, 8, 8
    F = 32

    key = jax.random.PRNGKey(0)
    k_x, k_w, k_b = jax.random.split(key, 3)
    mvimages = jax.random.normal(k_x, (B, V, C, D, H, W), dtype=jnp.float32)
    weight = jax.random.normal(k_w, (C, F), dtype=jnp.float32) * 0.1
    bias = jax.random.normal(k_b, (F,), dtype=jnp.float32) * 0.1

    ref_pooled, ref_aux = _reference(mvimages, weight, bias)

    # Default tiling (tiny shapes collapse to a single S block).
    pooled_view, aux = view_avg_aggregate(mvimages, weight, bias)
    # Forced 128-wide spatial chunks: exercises the multi-step accumulator path.
    pooled_view2, aux2 = view_avg_aggregate(mvimages, weight, bias,
                                            max_spatial_tile=128)
    jax.block_until_ready((pooled_view, aux, pooled_view2, aux2))

    assert pooled_view.shape == (B, F) and aux.shape == (B, V, F)
    assert jnp.allclose(pooled_view, ref_pooled, atol=1e-5, rtol=1e-5)
    assert jnp.allclose(aux, ref_aux, atol=1e-5, rtol=1e-5)
    assert jnp.allclose(pooled_view2, ref_pooled, atol=1e-5, rtol=1e-5)
    assert jnp.allclose(aux2, ref_aux, atol=1e-5, rtol=1e-5)

    print("KERNEL_OK")
</pallas_src>

<mosaic_0001>
module attributes {stable_mosaic.version = 11 : i64} {
  func.func @_view_avg_kernel(%arg0: i32, %arg1: i32, %arg2: memref<32x256xf32, #tpu.memory_space<vmem>>, %arg3: memref<4x128xf32, #tpu.memory_space<vmem>>, %arg4: memref<1x128xf32, #tpu.memory_space<vmem>>, %arg5: memref<8x128xf32, #tpu.memory_space<vmem>>, %arg6: memref<2x128xf32, #tpu.memory_space<vmem>>, %arg7: memref<32x1xf32, #tpu.memory_space<vmem>>) attributes {dimension_semantics = [#tpu.dimension_semantics<parallel>, #tpu.dimension_semantics<arbitrary>], iteration_bounds = array<i64: 1, 1>, scalar_prefetch = 0 : i64, scratch_operands = 1 : i64, tpu.core_type = #tpu.core_type<tc>, window_params = [{transform_indices = @transform_0, window_bounds = array<i64: 32, 256>}, {pipeline_mode = #tpu.pipeline_mode<synchronous>, transform_indices = @transform_1, window_bounds = array<i64: 4, 128>}, {pipeline_mode = #tpu.pipeline_mode<synchronous>, transform_indices = @transform_2, window_bounds = array<i64: 1, 128>}, {transform_indices = @transform_3, window_bounds = array<i64: 8, 128>}, {transform_indices = @transform_4, window_bounds = array<i64: 2, 128>}]} {
    %c0_i32 = arith.constant 0 : i32
    %0 = arith.cmpi eq, %arg1, %c0_i32 : i32
    %1 = arith.extui %0 : i1 to i32
    %c0_i32_0 = arith.constant 0 : i32
    %2 = arith.cmpi ne, %1, %c0_i32_0 : i32
    scf.if %2 {
      %cst_8 = arith.constant 0.000000e+00 : f32
      %12 = vector.broadcast %cst_8 : f32 to vector<32x1xf32>
      %c0_9 = arith.constant 0 : index
      %c0_10 = arith.constant 0 : index
      %13 = vector.load %arg7[%c0_9, %c0_10] : memref<32x1xf32, #tpu.memory_space<vmem>>, vector<32x1xf32>
      tpu.vector_store %arg7[%c0_9, %c0_10], %12 {strides = array<i32>} : memref<32x1xf32, #tpu.memory_space<vmem>>, vector<32x1xf32>,
    } else {
    }
    %c0 = arith.constant 0 : index
    %c0_1 = arith.constant 0 : index
    %3 = vector.load %arg2[%c0, %c0_1] : memref<32x256xf32, #tpu.memory_space<vmem>>, vector<32x256xf32>
    %c0_2 = arith.constant 0 : index
    %c0_3 = arith.constant 0 : index
    %4 = vector.load %arg7[%c0_2, %c0_3] : memref<32x1xf32, #tpu.memory_space<vmem>>, vector<32x1xf32>
    %cst = arith.constant dense<0.000000e+00> : vector<32xf32>
    %5 = vector.multi_reduction <add>, %3, %cst [1] : vector<32x256xf32> to vector<32xf32>
    %6 = vector.shape_cast %5 : vector<32xf32> to vector<32x1xf32>
    %7 = arith.addf %4, %6 : vector<32x1xf32>
    %c0_4 = arith.constant 0 : index
    %c0_5 = arith.constant 0 : index
    %8 = vector.load %arg7[%c0_4, %c0_5] : memref<32x1xf32, #tpu.memory_space<vmem>>, vector<32x1xf32>
    tpu.vector_store %arg7[%c0_4, %c0_5], %7 {strides = array<i32>} : memref<32x1xf32, #tpu.memory_space<vmem>>, vector<32x1xf32>,
    %c0_i32_6 = arith.constant 0 : i32
    %9 = arith.cmpi eq, %arg1, %c0_i32_6 : i32
    %10 = arith.extui %9 : i1 to i32
    %c0_i32_7 = arith.constant 0 : i32
    %11 = arith.cmpi ne, %10, %c0_i32_7 : i32
    scf.if %11 {
      %cst_8 = arith.constant 0.000000e+00 : f32
      %12 = vector.broadcast %cst_8 : f32 to vector<8x128xf32>
      %c0_9 = arith.constant 0 : index
      %c0_10 = arith.constant 0 : index
      %13 = vector.load %arg4[%c0_9, %c0_10] : memref<1x128xf32, #tpu.memory_space<vmem>>, vector<1x128xf32>
      %14 = vector.broadcast %13 : vector<1x128xf32> to vector<8x128xf32>
      %15 = arith.addf %12, %14 : vector<8x128xf32>
      %c0_11 = arith.constant 0 : index
      %c0_12 = arith.constant 0 : index
      %16 = tpu.strided_load %arg7[%c0_11, %c0_12] {strides = array<i32: 4, 1>} : memref<32x1xf32, #tpu.memory_space<vmem>>, vector<8x1xf32>
      %cst_13 = arith.constant 3.906250e-03 : f32
      %17 = vector.broadcast %cst_13 : f32 to vector<8x1xf32>
      %18 = arith.mulf %16, %17 : vector<8x1xf32>
      %c0_14 = arith.constant 0 : index
      %c0_15 = arith.constant 0 : index
      %19 = vector.load %arg3[%c0_14, %c0_15] : memref<4x128xf32, #tpu.memory_space<vmem>>, vector<1x128xf32>
      %20 = vector.broadcast %18 : vector<8x1xf32> to vector<8x128xf32>
      %21 = vector.broadcast %19 : vector<1x128xf32> to vector<8x128xf32>
      %22 = arith.mulf %20, %21 : vector<8x128xf32>
      %23 = arith.addf %15, %22 : vector<8x128xf32>
      %c1 = arith.constant 1 : index
      %c0_16 = arith.constant 0 : index
      %24 = tpu.strided_load %arg7[%c1, %c0_16] {strides = array<i32: 4, 1>} : memref<32x1xf32, #tpu.memory_space<vmem>>, vector<8x1xf32>
      %cst_17 = arith.constant 3.906250e-03 : f32
      %25 = vector.broadcast %cst_17 : f32 to vector<8x1xf32>
      %26 = arith.mulf %24, %25 : vector<8x1xf32>
      %c1_18 = arith.constant 1 : index
      %c0_19 = arith.constant 0 : index
      %27 = vector.load %arg3[%c1_18, %c0_19] : memref<4x128xf32, #tpu.memory_space<vmem>>, vector<1x128xf32>
      %28 = vector.broadcast %26 : vector<8x1xf32> to vector<8x128xf32>
      %29 = vector.broadcast %27 : vector<1x128xf32> to vector<8x128xf32>
      %30 = arith.mulf %28, %29 : vector<8x128xf32>
      %31 = arith.addf %23, %30 : vector<8x128xf32>
      %c2 = arith.constant 2 : index
      %c0_20 = arith.constant 0 : index
      %32 = tpu.strided_load %arg7[%c2, %c0_20] {strides = array<i32: 4, 1>} : memref<32x1xf32, #tpu.memory_space<vmem>>, vector<8x1xf32>
      %cst_21 = arith.constant 3.906250e-03 : f32
      %33 = vector.broadcast %cst_21 : f32 to vector<8x1xf32>
      %34 = arith.mulf %32, %33 : vector<8x1xf32>
      %c2_22 = arith.constant 2 : index
      %c0_23 = arith.constant 0 : index
      %35 = vector.load %arg3[%c2_22, %c0_23] : memref<4x128xf32, #tpu.memory_space<vmem>>, vector<1x128xf32>
      %36 = vector.broadcast %34 : vector<8x1xf32> to vector<8x128xf32>
      %37 = vector.broadcast %35 : vector<1x128xf32> to vector<8x128xf32>
      %38 = arith.mulf %36, %37 : vector<8x128xf32>
      %39 = arith.addf %31, %38 : vector<8x128xf32>
      %c3 = arith.constant 3 : index
      %c0_24 = arith.constant 0 : index
      %40 = tpu.strided_load %arg7[%c3, %c0_24] {strides = array<i32: 4, 1>} : memref<32x1xf32, #tpu.memory_space<vmem>>, vector<8x1xf32>
      %cst_25 = arith.constant 3.906250e-03 : f32
      %41 = vector.broadcast %cst_25 : f32 to vector<8x1xf32>
      %42 = arith.mulf %40, %41 : vector<8x1xf32>
      %c3_26 = arith.constant 3 : index
      %c0_27 = arith.constant 0 : index
      %43 = vector.load %arg3[%c3_26, %c0_27] : memref<4x128xf32, #tpu.memory_space<vmem>>, vector<1x128xf32>
      %44 = vector.broadcast %42 : vector<8x1xf32> to vector<8x128xf32>
      %45 = vector.broadcast %43 : vector<1x128xf32> to vector<8x128xf32>
      %46 = arith.mulf %44, %45 : vector<8x128xf32>
      %47 = arith.addf %39, %46 : vector<8x128xf32>
      %c0_28 = arith.constant 0 : index
      %c0_29 = arith.constant 0 : index
      %48 = vector.load %arg5[%c0_28, %c0_29] : memref<8x128xf32, #tpu.memory_space<vmem>>, vector<8x128xf32>
      tpu.vector_store %arg5[%c0_28, %c0_29], %47 {strides = array<i32>} : memref<8x128xf32, #tpu.memory_space<vmem>>, vector<8x128xf32>,
      %cst_30 = arith.constant 0.000000e+00 : f32
      %49 = vector.broadcast %cst_30 : f32 to vector<2x128xf32>
      %c0_31 = arith.constant 0 : index
      %c0_32 = arith.constant 0 : index
      %50 = tpu.strided_load %arg5[%c0_31, %c0_32] {strides = array<i32: 4, 1>} : memref<8x128xf32, #tpu.memory_space<vmem>>, vector<2x128xf32>
      %51 = arith.addf %49, %50 : vector<2x128xf32>
      %c1_33 = arith.constant 1 : index
      %c0_34 = arith.constant 0 : index
      %52 = tpu.strided_load %arg5[%c1_33, %c0_34] {strides = array<i32: 4, 1>} : memref<8x128xf32, #tpu.memory_space<vmem>>, vector<2x128xf32>
      %53 = arith.addf %51, %52 : vector<2x128xf32>
      %c2_35 = arith.constant 2 : index
      %c0_36 = arith.constant 0 : index
      %54 = tpu.strided_load %arg5[%c2_35, %c0_36] {strides = array<i32: 4, 1>} : memref<8x128xf32, #tpu.memory_space<vmem>>, vector<2x128xf32>
      %55 = arith.addf %53, %54 : vector<2x128xf32>
      %c3_37 = arith.constant 3 : index
      %c0_38 = arith.constant 0 : index
      %56 = tpu.strided_load %arg5[%c3_37, %c0_38] {strides = array<i32: 4, 1>} : memref<8x128xf32, #tpu.memory_space<vmem>>, vector<2x128xf32>
      %57 = arith.addf %55, %56 : vector<2x128xf32>
      %cst_39 = arith.constant 2.500000e-01 : f32
      %58 = vector.broadcast %cst_39 : f32 to vector<2x128xf32>
      %59 = arith.mulf %57, %58 : vector<2x128xf32>
      %c0_40 = arith.constant 0 : index
      %c0_41 = arith.constant 0 : index
      %60 = vector.load %arg6[%c0_40, %c0_41] : memref<2x128xf32, #tpu.memory_space<vmem>>, vector<2x128xf32>
      tpu.vector_store %arg6[%c0_40, %c0_41], %59 {strides = array<i32>} : memref<2x128xf32, #tpu.memory_space<vmem>>, vector<2x128xf32>,
    } else {
    }
    return
  }
  func.func @transform_0(%arg0: i32, %arg1: i32) -> (i32, i32) {
    %c0_i32 = arith.constant 0 : i32
    return %arg0, %arg1 : i32, i32
  }
  func.func @transform_1(%arg0: i32, %arg1: i32) -> (i32, i32) {
    %c0_i32 = arith.constant 0 : i32
    %c0_i32_0 = arith.constant 0 : i32
    %c0_i32_1 = arith.constant 0 : i32
    return %c0_i32, %c0_i32_0 : i32, i32
  }
  func.func @transform_2(%arg0: i32, %arg1: i32) -> (i32, i32) {
    %c0_i32 = arith.constant 0 : i32
    %c0_i32_0 = arith.constant 0 : i32
    %c0_i32_1 = arith.constant 0 : i32
    return %c0_i32, %c0_i32_0 : i32, i32
  }
  func.func @transform_3(%arg0: i32, %arg1: i32) -> (i32, i32) {
    %c0_i32 = arith.constant 0 : i32
    %c0_i32_0 = arith.constant 0 : i32
    return %arg0, %c0_i32 : i32, i32
  }
  func.func @transform_4(%arg0: i32, %arg1: i32) -> (i32, i32) {
    %c0_i32 = arith.constant 0 : i32
    %c0_i32_0 = arith.constant 0 : i32
    return %arg0, %c0_i32 : i32, i32
  }
}

</mosaic_0001>

<bundles_post_ra>
// kernel: tpu_custom_call.1
= control target key start
LH: loop header
LB: loop body
LE: loop exit
PB: predicated region body
PF: predicated region fallthrough
CT: control target
= control target key end

     0   :  { %10 = vsyncpa [#allocation4], 0  ;;  %s403_s0 = inlined_call_operand.hbm [shape: f32[32,256], index: 0, kind: input, shape index: {}]   ;;  %s404_s1 = inlined_call_operand.hbm [shape: f32[4,128], index: 1, kind: input, shape index: {}]   ;;  %s405_s2 = inlined_call_operand.vmem [shape: f32[1,128], index: 2, kind: input, shape index: {}]   ;;  %s406_s3 = inlined_call_operand.hbm [shape: f32[8,128], index: 3, kind: output, shape index: {0}]   ;;  %s407_s4 = inlined_call_operand.hbm [shape: f32[2,128], index: 4, kind: output, shape index: {1}]  }
   0x1   :  { %11 = vsyncpa [#allocation7], 0 }
   0x2   :  { %12 = vsyncpa [#allocation5], 0 }
   0x3   :  { %13 = vsyncpa [#allocation10], 0  ;;  %s311_s15 = smov [#allocation3]   ;;  %s215_s19 = scalar_lea.hbm %s403_s0, 1024 }
   0x4   :  { %s19_s16 = sshll.u32 %s311_s15, 4  ;;  %p216_p0 = scmp.ne.s32.totalorder %s403_s0, %s215_s19  ;;  %s20_s16 = int_to_ptr.vmem [resolvable:$true] %s19_s16 }
   0x5   :  { %p219_p1 = scmp.lt.u32.totalorder %s215_s19, %s403_s0 }
   0x7   :  { %p221_p2 = pnand %p219_p1, %p216_p0 }
   0x9   :  { %224 = shalt.err (!%p221_p2)
}
   0xa   :  { %s225_s24 = scalar_lea.vmem %s20_s16, 1024  ;;  %p230_p4 = scmp.lt.s32.totalorder %s20_s16, %s20_s16 }
   0xb   :  { %p226_p3 = scmp.ne.s32.totalorder %s20_s16, %s225_s24  ;;  %p231_p5 = scmp.lt.s32.totalorder %s225_s24, %s225_s24 }
   0xd   :  { %p232_p6 = por %p231_p5, %p230_p4 }
   0xf   :  { %p233_p7 = pnand %p232_p6, %p226_p3 }
  0x11   :  { %236 = shalt.err (!%p233_p7)
}
  0x12   :  { %s312_s25 = smov 256   ;;  %s313_s26 = smov 16  }
  0x13   :  { %25 = dma.hbm_to_vmem [thread:$0]  %s403_s0, 1024, %s20_s16, [#allocation4], %s312_s25, %s312_s25, %s313_s26  }
  0x14   :  { %s314_s29 = smov [#allocation6]   ;;  %s237_s7 = scalar_lea.hbm %s404_s1, 64 }
  0x15   :  { %s32_s30 = sshll.u32 %s314_s29, 4  ;;  %p238_p8 = scmp.ne.s32.totalorder %s404_s1, %s237_s7  ;;  %s33_s30 = int_to_ptr.vmem [resolvable:$true] %s32_s30 }
  0x16   :  { %p241_p9 = scmp.lt.u32.totalorder %s237_s7, %s404_s1 }
  0x18   :  { %p243_p10 = pnand %p241_p9, %p238_p8 }
  0x1a   :  { %246 = shalt.err (!%p243_p10)
}
  0x1b   :  { %s247_s12 = scalar_lea.vmem %s33_s30, 64  ;;  %p252_p12 = scmp.lt.s32.totalorder %s33_s30, %s33_s30 }
  0x1c   :  { %p248_p11 = scmp.ne.s32.totalorder %s33_s30, %s247_s12  ;;  %p253_p13 = scmp.lt.s32.totalorder %s247_s12, %s247_s12 }
  0x1e   :  { %p254_p0 = por %p253_p13, %p252_p12 }
  0x20   :  { %p255_p1 = pnand %p254_p0, %p248_p11 }
  0x22   :  { %258 = shalt.err (!%p255_p1)
}
  0x23   :  { %35 = dma.hbm_to_vmem [thread:$0]  %s404_s1, 64, %s33_s30, [#allocation7]  }
  0x24   :  { %303 = dma.done.wait [#allocation4], 1024  }
  0x25   :  { %304 = vsyncadd [#allocation4], 4294966272 }
  0x26   :  { %305 = dma.done.wait [#allocation7], 64  }
  0x27   :  { %306 = vsyncadd [#allocation7], 4294967232  ;;  %vm48_vm0 = vcmask 7168   ;;  %v315_v0 = vmov 0.0   ;;  %v57_v1 = vld [vmem:[#allocation3 + $0x20] sm:$0xff]  ;;  %v58_v2 = vld [vmem:[#allocation3 + $0x28] sm:$0xff] }
  0x28   :  { %51 = vst.msk [vmem:[#allocation2 + $0x10] sm:$0xff] %vm48_vm0, %v315_v0  ;;  %49 = vst.msk [vmem:[#allocation2] sm:$0xff] %vm48_vm0, %v315_v0  ;;  %v53_v3 = vld [vmem:[#allocation3] sm:$0xff]  ;;  %v71_v4 = vadd.f32 %v58_v2, %v57_v1  ;;  %v54_v5 = vld [vmem:[#allocation3 + $0x8] sm:$0xff]  ;;  %v316_v13 = vmov 0   ;;  %s317_s15 = smov [#allocation8]  }
  0x29   :  { %50 = vst.msk [vmem:[#allocation2 + $0x8] sm:$0xff] %vm48_vm0, %v315_v0  ;;  %52 = vst.msk [vmem:[#allocation2 + $0x18] sm:$0xff] %vm48_vm0, %v315_v0  ;;  %v59_v6 = vld [vmem:[#allocation3 + $0x30] sm:$0xff]  ;;  %v60_v7 = vld [vmem:[#allocation3 + $0x38] sm:$0xff]  ;;  %v65_v8 = vadd.f32 %v54_v5, %v53_v3  ;;  %214 = vset.pattern.permute.xlu1 %v316_v13  ;;  %213 = vset.pattern.permute.xlu0 %v316_v13  ;;  %s176_s16 = sshll.u32 %s317_s15, 4  ;;  %s177_s16 = int_to_ptr.vmem [resolvable:$true] %s176_s16 }
  0x2a   :  { %v55_v9 = vld [vmem:[#allocation3 + $0x10] sm:$0xff]  ;;  %v56_v10 = vld [vmem:[#allocation3 + $0x18] sm:$0xff]  ;;  %72 = vadd.xlane.f32.xlu1 %v71_v4  ;;  %v74_v11 = vadd.f32 %v60_v7, %v59_v6  ;;  %v201_v34 = vld [vmem:[#allocation6] ss:$0 sm:$0xff]  ;;  %s259_s17 = scalar_lea.vmem %s177_s16, 128  ;;  %p264_p3 = scmp.lt.s32.totalorder %s177_s16, %s177_s16 }
  0x2b   :  { %66 = vadd.xlane.f32.xlu0 %v65_v8  ;;  %v68_v12 = vadd.f32 %v56_v10, %v55_v9  ;;  %v202_v35 = vld [vmem:[#allocation6 + $0x1] ss:$0 sm:$0xff]  ;;  %v200_v37 = vld [vmem:[%s405_s2] ss:$0 sm:$0xff]  ;;  %v203_v40 = vld [vmem:[#allocation6 + $0x2] ss:$0 sm:$0xff]  ;;  %p260_p2 = scmp.ne.s32.totalorder %s177_s16, %s259_s17  ;;  %p265_p4 = scmp.lt.s32.totalorder %s259_s17, %s259_s17 }
  0x2c   :  { %v204_v46 = vld [vmem:[#allocation6 + $0x3] ss:$0 sm:$0xff] }
  0x2d   :  { %p266_p5 = por %p265_p4, %p264_p3 }
  0x2e   :  { %75 = vadd.xlane.f32.xlu1 %v74_v11 }
  0x2f   :  { %69 = vadd.xlane.f32.xlu0 %v68_v12  ;;  %v63_v14 = vld [vmem:[#allocation2 + $0x10] sm:$0xff]  ;;  %v61_v15 = vld [vmem:[#allocation2] sm:$0xff]  ;;  %p267_p6 = pnand %p266_p5, %p260_p2 }
  0x30   :  { %v64_v20 = vld [vmem:[#allocation2 + $0x18] sm:$0xff]  ;;  %v62_v21 = vld [vmem:[#allocation2 + $0x8] sm:$0xff] }
  0xb7   :  { %v73_v16 = vpop.xlane.xlu1 %72 }
  0xb8   :  { %v79_v17 = vadd.f32 %v73_v16, %v63_v14  ;;  %v67_v18 = vpop.xlane.xlu0 %66 }
  0xb9   :  { %v77_v19 = vadd.f32 %v67_v18, %v61_v15 }
  0xba   :  { %84 = vst.msk [vmem:[#allocation2 + $0x10] sm:$0xff] %vm48_vm0, %v79_v17 }
  0xbb   :  { %82 = vst.msk [vmem:[#allocation2] sm:$0xff] %vm48_vm0, %v77_v19  ;;  %v76_v22 = vpop.xlane.xlu1 %75 }
  0xbc   :  { %v80_v23 = vadd.f32 %v76_v22, %v64_v20  ;;  %v70_v24 = vpop.xlane.xlu0 %69 }
  0xbd   :  { %v78_v25 = vadd.f32 %v70_v24, %v62_v21 }
  0xbe   :  { %85 = vst.msk [vmem:[#allocation2 + $0x18] sm:$0xff] %vm48_vm0, %v80_v23 }
  0xbf   :  { %83 = vst.msk [vmem:[#allocation2 + $0x8] sm:$0xff] %vm48_vm0, %v78_v25 }
  0xc6   :  { %v112_v26 = vld [vmem:[#allocation2 + $0x1] ss:$4 sm:$0xff]  ;;  %v97_v27 = vld [vmem:[#allocation2] ss:$4 sm:$0xff]  ;;  %v127_v30 = vld [vmem:[#allocation2 + $0x2] ss:$4 sm:$0xff] }
  0xc7   :  { %v113_v28 = vmul.f32 0.00390625, %v112_v26  ;;  %v98_v29 = vmul.f32 0.00390625, %v97_v27  ;;  %v128_v31 = vmul.f32 0.00390625, %v127_v30  ;;  %v142_v32 = vld [vmem:[#allocation2 + $0x3] ss:$4 sm:$0xff] }
  0xc8   :  { %v143_v33 = vmul.f32 0.00390625, %v142_v32 }
  0xc9   :  { %117 = vperm.xlu1 %214, %v113_v28   ;;  %102 = vperm.xlu0 %213, %v98_v29  }
  0xcd   :  { %132 = vperm.xlu1 %214, %v128_v31  }
  0xd1   :  { %147 = vperm.xlu1 %214, %v143_v33  }
 0x148   :  { %v118_v36 = vpop.permute.xlu1 %117  ;;  %v103_v38 = vpop.permute.xlu0 %102 }
 0x149   :  { %v109_v39 = vmul.f32 %v201_v34, %v103_v38  ;;  %v124_v41 = vmul.f32 %v202_v35, %v118_v36 }
 0x14b   :  { %v110_v42 = vadd.f32 %v200_v37, %v109_v39 }
 0x14c   :  { %v133_v43 = vpop.permute.xlu1 %132 }
 0x14d   :  { %v125_v44 = vadd.f32 %v124_v41, %v110_v42  ;;  %v139_v45 = vmul.f32 %v203_v40, %v133_v43 }
 0x14f   :  { %v140_v48 = vadd.f32 %v139_v45, %v125_v44 }
 0x150   :  { %v148_v47 = vpop.permute.xlu1 %147 }
 0x151   :  { %v154_v49 = vmul.f32 %v204_v46, %v148_v47 }
 0x153   :  { %v155_v50 = vadd.f32 %v154_v49, %v140_v48 }
 0x155   :  { %156 = vst [vmem:[#allocation8] sm:$0xff] %v155_v50 }
 0x156   :  { %270 = shalt.err (!%p267_p6)
}
 0x157   :  { %s271_s19 = scalar_lea.hbm %s406_s3, 128 }
 0x158   :  { %p272_p7 = scmp.ne.s32.totalorder %s406_s3, %s271_s19  ;;  %p275_p8 = scmp.lt.u32.totalorder %s271_s19, %s406_s3 }
 0x15a   :  { %p277_p9 = pnand %p275_p8, %p272_p7 }
 0x15c   :  { %280 = shalt.err (!%p277_p9)
}
 0x15d   :  { %179 = dma.vmem_to_hbm [thread:$0]  %s177_s16, 128, %s406_s3, [#allocation5]   ;;  %v157_v51 = vld [vmem:[#allocation8] ss:$4 sm:$0x3] }
 0x15e   :  { %v160_v52 = vld [vmem:[#allocation8 + $0x1] ss:$4 sm:$0x3]  ;;  %v163_v54 = vld [vmem:[#allocation8 + $0x2] ss:$4 sm:$0x3] }
 0x15f   :  { %v161_v53 = vadd.f32 %v160_v52, %v157_v51  ;;  %v166_v56 = vld [vmem:[#allocation8 + $0x3] ss:$4 sm:$0x3]  ;;  %s318_s26 = smov [#allocation9]  }
 0x160   :  { %s186_s27 = sshll.u32 %s318_s26, 4  ;;  %s187_s27 = int_to_ptr.vmem [resolvable:$true] %s186_s27 }
 0x161   :  { %v164_v55 = vadd.f32 %v163_v54, %v161_v53  ;;  %s281_s28 = scalar_lea.vmem %s187_s27, 32  ;;  %p286_p11 = scmp.lt.s32.totalorder %s187_s27, %s187_s27 }
 0x162   :  { %p282_p10 = scmp.ne.s32.totalorder %s187_s27, %s281_s28  ;;  %p287_p12 = scmp.lt.s32.totalorder %s281_s28, %s281_s28 }
 0x163   :  { %v167_v57 = vadd.f32 %v166_v56, %v164_v55 }
 0x164   :  { %p288_p13 = por %p287_p12, %p286_p11 }
 0x165   :  { %v168_v58 = vmul.f32 0.25, %v167_v57 }
 0x166   :  { %p289_p0 = pnand %p288_p13, %p282_p10 }
 0x167   :  { %169 = vst [vmem:[#allocation9] sm:$0x3] %v168_v58 }
 0x168   :  { %292 = shalt.err (!%p289_p0)
}
 0x169   :  { %s293_s30 = scalar_lea.hbm %s407_s4, 32 }
 0x16a   :  { %p294_p1 = scmp.ne.s32.totalorder %s407_s4, %s293_s30  ;;  %p297_p2 = scmp.lt.u32.totalorder %s293_s30, %s407_s4 }
 0x16c   :  { %p299_p3 = pnand %p297_p2, %p294_p1 }
 0x16e   :  { %302 = shalt.err (!%p299_p3)
}
 0x16f   :  { %189 = dma.vmem_to_hbm [thread:$0]  %s187_s27, 32, %s407_s4, [#allocation10]  }
 0x170   :  { %307 = dma.done.wait [#allocation5], 128  }
 0x171   :  { %308 = vsyncadd [#allocation5], 4294967168 }
 0x172   :  { %309 = dma.done.wait [#allocation10], 32  }
 0x173   :  { %310 = vsyncadd [#allocation10], 4294967264 }
 0x174   :  { %196 = vsyncpa [#allocation4], 1 }
 0x175   :  { %197 = vsyncpa [#allocation7], 1 }
 0x176   :  { %198 = vsyncpa [#allocation5], 1 }
 0x177   :  { %199 = vsyncpa [#allocation10], 1 }

</bundles_post_ra>
